<compile_context>
chip_gen: v7x
topology: tpu7x:2x2x1
jax: 0.10.0
libtpu: 0.0.40
codegen_flags: <defaults>
</compile_context>

<pallas_src>
import functools

import jax
import jax.numpy as jnp
from jax.experimental import pallas as pl
from jax.experimental.pallas import tpu as pltpu


def _round_up(x, m):
    return (x + m - 1) // m * m


def _vmem_budget_bytes():
    """~75% of this generation's per-core VMEM (48 MiB v7x, 96 MiB v5e/v6e)."""
    try:
        cap = int(pltpu.get_tpu_info().vmem_capacity_bytes)
    except Exception:
        cap = 64 * 1024 * 1024
    return cap * 3 // 4


# ----------------------------------------------------------------------------
# Kernels
# ----------------------------------------------------------------------------
def net1_resident_kernel(x_ref, w0_ref, b0_ref, w1_ref, b1_ref, w2_ref, b2_ref,
                         o_ref, *, nb):
    """Weights-resident variant: one grid step per batch tile, all blocks here.

    x_ref  : [TB, Fp]          w0_ref : [Fp, Np]    b0_ref : [1, Np]
    w1_ref : [nb, Np, Np]      b1_ref : [nb, 1, Np]
    w2_ref : [nb, Np, Np]      b2_ref : [nb, 1, Np]
    o_ref  : [TB, Np] (f32)
    """
    h = jnp.maximum(
        jnp.dot(x_ref[...], w0_ref[...], preferred_element_type=jnp.float32)
        + b0_ref[...], 0.0)
    for blk in range(nb):
        out = jnp.dot(h.astype(w1_ref.dtype), w1_ref[blk],
                      preferred_element_type=jnp.float32) + b1_ref[blk]
        out = jnp.maximum(out, 0.0)          # relu(linear1(x)); dropout = id
        out = jnp.dot(out.astype(w2_ref.dtype), w2_ref[blk],
                      preferred_element_type=jnp.float32) + b2_ref[blk]
        h = jnp.maximum(out + h, 0.0)        # skip connection + relu
    o_ref[...] = h.astype(o_ref.dtype)


def net1_streamed_kernel(x_ref, w0_ref, b0_ref, b1_ref, b2_ref, w1_ref, w2_ref,
                         o_ref, h_ref, *, unroll):
    """Streamed variant: grid = (batch_tiles, nbp // unroll).

    x_ref  : [TB, Fp]   w0_ref : [Fp, Np]   b0_ref : [1, Np]     (resident)
    b1_ref : [nbp, 1, Np]  b2_ref : [nbp, 1, Np]  (resident f32, all biases)
    w1_ref : [U, Np, Np]   w2_ref : [U, Np, Np]   (streamed per grid step)
    o_ref  : [TB, Np] f32
    h_ref  : VMEM scratch [TB, Np] f32, carried across the block axis.
    """
    blk = pl.program_id(1)

    @pl.when(blk == 0)
    def _():
        h0 = jnp.dot(x_ref[...], w0_ref[...],
                     preferred_element_type=jnp.float32) + b0_ref[...]
        h_ref[...] = jnp.maximum(h0, 0.0)

    h = h_ref[...]
    for u in range(unroll):
        idx = blk * unroll + u
        out = jnp.dot(h.astype(w1_ref.dtype), w1_ref[u],
                      preferred_element_type=jnp.float32) + b1_ref[idx]
        out = jnp.maximum(out, 0.0)
        out = jnp.dot(out.astype(w2_ref.dtype), w2_ref[u],
                      preferred_element_type=jnp.float32) + b2_ref[idx]
        h = jnp.maximum(out + h, 0.0)
    h_ref[...] = h

    @pl.when(blk == pl.num_programs(1) - 1)
    def _():
        o_ref[...] = h_ref[...].astype(o_ref.dtype)


# ----------------------------------------------------------------------------
# Wrapper
# ----------------------------------------------------------------------------
def net1_forward(x, params, num_blocks, *, batch_tile=256,
                 compute_dtype=jnp.bfloat16, mode="auto", unroll=None):
    """Whole Net1 forward pass (eval mode) as pipelined pallas_call(s).

    mode: "auto" (pick by VMEM budget), "resident", or "streamed".
    unroll: optional cap on residual blocks per grid step (streamed mode).
    """
    w0, b0, w1s, b1s, w2s, b2s = params
    B, F = x.shape
    N = w0.shape[1]
    nb = num_blocks
    assert nb >= 1, "net1_forward expects at least one residual block"
    assert w1s.shape[0] == nb

    cd = jnp.dtype(compute_dtype)
    itm = cd.itemsize

    # Lane-dense padding: feature/neuron dims -> x128, batch tile -> x8.
    Fp = _round_up(F, 128)
    Np = _round_up(N, 128)
    TB = min(_round_up(batch_tile, 8), _round_up(B, 8))
    Bp = _round_up(B, TB)
    num_batch_tiles = Bp // TB
    batch_sem = "parallel" if num_batch_tiles > 1 else "arbitrary"

    budget = _vmem_budget_bytes()

    # Zero-pad inputs/weights/biases; padded lanes stay exactly zero through
    # the bias/ReLU/residual chain, so slicing the output back is exact.
    xp = jnp.zeros((Bp, Fp), cd).at[:B, :F].set(x.astype(cd))
    w0p = jnp.zeros((Fp, Np), cd).at[:F, :N].set(w0.astype(cd))
    b0p = jnp.zeros((1, Np), jnp.float32).at[:, :N].set(b0.astype(jnp.float32))

    # Conservative VMEM accounting (every pipelined input counted x2).
    fixed_need = (2 * TB * Fp * itm            # x
                  + 2 * Fp * Np * itm          # w0
                  + 2 * Np * 4                 # b0
                  + 2 * TB * Np * 4            # output
                  + TB * Np * 4)               # activations / scratch
    bias_need = 2 * 2 * nb * Np * 4            # b1 + b2 (f32, resident)
    resident_w_need = 2 * 2 * nb * Np * Np * itm

    use_resident = (mode == "resident") or (
        mode == "auto" and fixed_need + bias_need + resident_w_need <= budget)

    if use_resident:
        w1p = jnp.zeros((nb, Np, Np), cd).at[:, :N, :N].set(w1s.astype(cd))
        w2p = jnp.zeros((nb, Np, Np), cd).at[:, :N, :N].set(w2s.astype(cd))
        b1p = jnp.zeros((nb, 1, Np), jnp.float32).at[:, :, :N].set(
            b1s.astype(jnp.float32))
        b2p = jnp.zeros((nb, 1, Np), jnp.float32).at[:, :, :N].set(
            b2s.astype(jnp.float32))

        out_padded = pl.pallas_call(
            functools.partial(net1_resident_kernel, nb=nb),
            out_shape=jax.ShapeDtypeStruct((Bp, Np), jnp.float32),
            grid_spec=pltpu.PrefetchScalarGridSpec(
                num_scalar_prefetch=0,
                grid=(num_batch_tiles,),
                in_specs=[
                    pl.BlockSpec((TB, Fp), lambda bi: (bi, 0)),
                    pl.BlockSpec((Fp, Np), lambda bi: (0, 0)),
                    pl.BlockSpec((1, Np), lambda bi: (0, 0)),
                    pl.BlockSpec((nb, Np, Np), lambda bi: (0, 0, 0)),
                    pl.BlockSpec((nb, 1, Np), lambda bi: (0, 0, 0)),
                    pl.BlockSpec((nb, Np, Np), lambda bi: (0, 0, 0)),
                    pl.BlockSpec((nb, 1, Np), lambda bi: (0, 0, 0)),
                ],
                out_specs=pl.BlockSpec((TB, Np), lambda bi: (bi, 0)),
            ),
            compiler_params=pltpu.CompilerParams(
                dimension_semantics=(batch_sem,),
                vmem_limit_bytes=int(budget),
            ),
        )(xp, w0p, b0p, w1p, b1p, w2p, b2p)
        return out_padded[:B, :N]

    # ---- Streamed variant: unroll U residual blocks per grid step ----
    per_u = 2 * 2 * Np * Np * itm              # double-buffered w1+w2 slab
    avail = max(budget - fixed_need - bias_need, per_u)
    U = int(max(1, min(nb, avail // per_u)))
    if unroll is not None:
        U = int(max(1, min(U, unroll)))
    nbp = _round_up(nb, U)

    # Zero-padded extra blocks are exact identities:
    #   relu(h @ 0 + 0) = 0;  0 @ 0 + 0 + h = h;  relu(h) = h  (h >= 0).
    w1p = jnp.zeros((nbp, Np, Np), cd).at[:nb, :N, :N].set(w1s.astype(cd))
    w2p = jnp.zeros((nbp, Np, Np), cd).at[:nb, :N, :N].set(w2s.astype(cd))
    b1p = jnp.zeros((nbp, 1, Np), jnp.float32).at[:nb, :, :N].set(
        b1s.astype(jnp.float32))
    b2p = jnp.zeros((nbp, 1, Np), jnp.float32).at[:nb, :, :N].set(
        b2s.astype(jnp.float32))

    grid = (num_batch_tiles, nbp // U)

    out_padded = pl.pallas_call(
        functools.partial(net1_streamed_kernel, unroll=U),
        out_shape=jax.ShapeDtypeStruct((Bp, Np), jnp.float32),
        grid_spec=pltpu.PrefetchScalarGridSpec(
            num_scalar_prefetch=0,
            grid=grid,
            in_specs=[
                pl.BlockSpec((TB, Fp), lambda bi, blk: (bi, 0)),
                pl.BlockSpec((Fp, Np), lambda bi, blk: (0, 0)),
                pl.BlockSpec((1, Np), lambda bi, blk: (0, 0)),
                pl.BlockSpec((nbp, 1, Np), lambda bi, blk: (0, 0, 0)),
                pl.BlockSpec((nbp, 1, Np), lambda bi, blk: (0, 0, 0)),
                pl.BlockSpec((U, Np, Np), lambda bi, blk: (blk, 0, 0)),
                pl.BlockSpec((U, Np, Np), lambda bi, blk: (blk, 0, 0)),
            ],
            out_specs=pl.BlockSpec((TB, Np), lambda bi, blk: (bi, 0)),
            scratch_shapes=[pltpu.VMEM((TB, Np), jnp.float32)],
        ),
        compiler_params=pltpu.CompilerParams(
            dimension_semantics=(batch_sem, "arbitrary"),
            vmem_limit_bytes=int(budget),
        ),
    )(xp, w0p, b0p, b1p, b2p, w1p, w2p)
    return out_padded[:B, :N]


# ----------------------------------------------------------------------------
# Params init + pure-JAX reference
# ----------------------------------------------------------------------------
def init_net1_params(key, num_features, num_residual_blocks, num_neurons):
    """PyTorch nn.Linear-style init (uniform(-1/sqrt(fan_in), 1/sqrt(fan_in))),
    weights stored as [in, out]."""

    def linear_init(key, fan_in, fan_out):
        kw, kb = jax.random.split(key)
        bound = 1.0 / jnp.sqrt(jnp.float32(fan_in))
        w = jax.random.uniform(kw, (fan_in, fan_out), jnp.float32, -bound, bound)
        b = jax.random.uniform(kb, (1, fan_out), jnp.float32, -bound, bound)
        return w, b

    keys = jax.random.split(key, 1 + 2 * num_residual_blocks)
    w0, b0 = linear_init(keys[0], num_features, num_neurons)

    w1_list, b1_list, w2_list, b2_list = [], [], [], []
    for i in range(num_residual_blocks):
        w1, b1 = linear_init(keys[1 + 2 * i], num_neurons, num_neurons)
        w2, b2 = linear_init(keys[2 + 2 * i], num_neurons, num_neurons)
        w1_list.append(w1); b1_list.append(b1)
        w2_list.append(w2); b2_list.append(b2)

    return (w0, b0,
            jnp.stack(w1_list), jnp.stack(b1_list),
            jnp.stack(w2_list), jnp.stack(b2_list))


def net1_reference(x, params, num_blocks):
    w0, b0, w1s, b1s, w2s, b2s = params
    h = jnp.maximum(x @ w0 + b0, 0.0)
    for blk in range(num_blocks):
        identity = h
        out = jnp.maximum(h @ w1s[blk] + b1s[blk], 0.0)
        out = out @ w2s[blk] + b2s[blk] + identity
        h = jnp.maximum(out, 0.0)
    return h


if __name__ == "__main__":
    batch = 8
    num_features = 32
    num_neurons = 64
    num_residual_blocks = 2

    key = jax.random.PRNGKey(0)
    kx, kp = jax.random.split(key)

    x = jax.random.normal(kx, (batch, num_features), jnp.float32)
    params = init_net1_params(kp, num_features, num_residual_blocks,
                              num_neurons)
    ref = net1_reference(x, params, num_residual_blocks)

    # 1) f32, weights-resident (auto) path — exact-ish check.
    out_f32 = jax.block_until_ready(
        net1_forward(x, params, num_residual_blocks,
                     compute_dtype=jnp.float32))
    assert out_f32.shape == (batch, num_neurons)
    assert jnp.allclose(out_f32, ref, atol=1e-4, rtol=1e-4), \
        "f32 resident path mismatch vs reference"

    # 2) bf16 default, weights-resident (auto) path — loose tolerance.
    out_bf16 = jax.block_until_ready(
        net1_forward(x, params, num_residual_blocks))
    assert jnp.allclose(out_bf16, ref, atol=0.1, rtol=0.1), \
        "bf16 resident path mismatch vs reference"

    # 3) bf16, forced streamed path with unroll=1 (exercises the block-axis
    #    pipeline, pl.when init/finalize and the VMEM activation carry).
    out_stream = jax.block_until_ready(
        net1_forward(x, params, num_residual_blocks,
                     mode="streamed", unroll=1))
    assert jnp.allclose(out_stream, ref, atol=0.1, rtol=0.1), \
        "bf16 streamed path mismatch vs reference"

    print("KERNEL_OK")
</pallas_src>

<mosaic_0001>
module attributes {stable_mosaic.version = 11 : i64} {
  func.func @net1_resident_kernel(%arg0: i32, %arg1: memref<8x128xf32, #tpu.memory_space<vmem>>, %arg2: memref<128x128xf32, #tpu.memory_space<vmem>>, %arg3: memref<1x128xf32, #tpu.memory_space<vmem>>, %arg4: memref<2x128x128xf32, #tpu.memory_space<vmem>>, %arg5: memref<2x1x128xf32, #tpu.memory_space<vmem>>, %arg6: memref<2x128x128xf32, #tpu.memory_space<vmem>>, %arg7: memref<2x1x128xf32, #tpu.memory_space<vmem>>, %arg8: memref<8x128xf32, #tpu.memory_space<vmem>>) attributes {dimension_semantics = [#tpu.dimension_semantics<arbitrary>], iteration_bounds = array<i64: 1>, scalar_prefetch = 0 : i64, scratch_operands = 0 : i64, tpu.core_type = #tpu.core_type<tc>, window_params = [{transform_indices = @transform_0, window_bounds = array<i64: 8, 128>}, {pipeline_mode = #tpu.pipeline_mode<synchronous>, transform_indices = @transform_1, window_bounds = array<i64: 128, 128>}, {pipeline_mode = #tpu.pipeline_mode<synchronous>, transform_indices = @transform_2, window_bounds = array<i64: 1, 128>}, {pipeline_mode = #tpu.pipeline_mode<synchronous>, transform_indices = @transform_3, window_bounds = array<i64: 2, 128, 128>}, {pipeline_mode = #tpu.pipeline_mode<synchronous>, transform_indices = @transform_4, window_bounds = array<i64: 2, 1, 128>}, {pipeline_mode = #tpu.pipeline_mode<synchronous>, transform_indices = @transform_5, window_bounds = array<i64: 2, 128, 128>}, {pipeline_mode = #tpu.pipeline_mode<synchronous>, transform_indices = @transform_6, window_bounds = array<i64: 2, 1, 128>}, {transform_indices = @transform_7, window_bounds = array<i64: 8, 128>}]} {
    %c0 = arith.constant 0 : index
    %c0_0 = arith.constant 0 : index
    %0 = vector.load %arg1[%c0, %c0_0] : memref<8x128xf32, #tpu.memory_space<vmem>>, vector<8x128xf32>
    %c0_1 = arith.constant 0 : index
    %c0_2 = arith.constant 0 : index
    %1 = vector.load %arg2[%c0_1, %c0_2] : memref<128x128xf32, #tpu.memory_space<vmem>>, vector<128x128xf32>
    %cst = arith.constant dense<0.000000e+00> : vector<8x128xf32>
    %2 = tpu.matmul %0, %1, %cst {dimension_numbers = #tpu.dot_dimension_numbers<[1], [0], [0], [1], [0, 0, 1, 1], [], []>} : vector<8x128xf32>, vector<128x128xf32>, vector<8x128xf32> -> vector<8x128xf32>
    %c0_3 = arith.constant 0 : index
    %c0_4 = arith.constant 0 : index
    %3 = vector.load %arg3[%c0_3, %c0_4] : memref<1x128xf32, #tpu.memory_space<vmem>>, vector<1x128xf32>
    %4 = vector.broadcast %3 : vector<1x128xf32> to vector<8x128xf32>
    %5 = arith.addf %2, %4 : vector<8x128xf32>
    %cst_5 = arith.constant 0.000000e+00 : f32
    %6 = vector.broadcast %cst_5 : f32 to vector<8x128xf32>
    %7 = arith.maximumf %5, %6 : vector<8x128xf32>
    %c0_6 = arith.constant 0 : index
    %c0_7 = arith.constant 0 : index
    %c0_8 = arith.constant 0 : index
    %8 = vector.load %arg4[%c0_6, %c0_7, %c0_8] : memref<2x128x128xf32, #tpu.memory_space<vmem>>, vector<1x128x128xf32>
    %9 = vector.shape_cast %8 : vector<1x128x128xf32> to vector<128x128xf32>
    %cst_9 = arith.constant dense<0.000000e+00> : vector<8x128xf32>
    %10 = tpu.matmul %7, %9, %cst_9 {dimension_numbers = #tpu.dot_dimension_numbers<[1], [0], [0], [1], [0, 0, 1, 1], [], []>} : vector<8x128xf32>, vector<128x128xf32>, vector<8x128xf32> -> vector<8x128xf32>
    %c0_10 = arith.constant 0 : index
    %c0_11 = arith.constant 0 : index
    %c0_12 = arith.constant 0 : index
    %11 = vector.load %arg5[%c0_10, %c0_11, %c0_12] : memref<2x1x128xf32, #tpu.memory_space<vmem>>, vector<1x1x128xf32>
    %12 = vector.shape_cast %11 : vector<1x1x128xf32> to vector<1x128xf32>
    %13 = vector.broadcast %12 : vector<1x128xf32> to vector<8x128xf32>
    %14 = arith.addf %10, %13 : vector<8x128xf32>
    %cst_13 = arith.constant 0.000000e+00 : f32
    %15 = vector.broadcast %cst_13 : f32 to vector<8x128xf32>
    %16 = arith.maximumf %14, %15 : vector<8x128xf32>
    %c0_14 = arith.constant 0 : index
    %c0_15 = arith.constant 0 : index
    %c0_16 = arith.constant 0 : index
    %17 = vector.load %arg6[%c0_14, %c0_15, %c0_16] : memref<2x128x128xf32, #tpu.memory_space<vmem>>, vector<1x128x128xf32>
    %18 = vector.shape_cast %17 : vector<1x128x128xf32> to vector<128x128xf32>
    %cst_17 = arith.constant dense<0.000000e+00> : vector<8x128xf32>
    %19 = tpu.matmul %16, %18, %cst_17 {dimension_numbers = #tpu.dot_dimension_numbers<[1], [0], [0], [1], [0, 0, 1, 1], [], []>} : vector<8x128xf32>, vector<128x128xf32>, vector<8x128xf32> -> vector<8x128xf32>
    %c0_18 = arith.constant 0 : index
    %c0_19 = arith.constant 0 : index
    %c0_20 = arith.constant 0 : index
    %20 = vector.load %arg7[%c0_18, %c0_19, %c0_20] : memref<2x1x128xf32, #tpu.memory_space<vmem>>, vector<1x1x128xf32>
    %21 = vector.shape_cast %20 : vector<1x1x128xf32> to vector<1x128xf32>
    %22 = vector.broadcast %21 : vector<1x128xf32> to vector<8x128xf32>
    %23 = arith.addf %19, %22 : vector<8x128xf32>
    %24 = arith.addf %23, %7 : vector<8x128xf32>
    %cst_21 = arith.constant 0.000000e+00 : f32
    %25 = vector.broadcast %cst_21 : f32 to vector<8x128xf32>
    %26 = arith.maximumf %24, %25 : vector<8x128xf32>
    %c1 = arith.constant 1 : index
    %c0_22 = arith.constant 0 : index
    %c0_23 = arith.constant 0 : index
    %27 = vector.load %arg4[%c1, %c0_22, %c0_23] : memref<2x128x128xf32, #tpu.memory_space<vmem>>, vector<1x128x128xf32>
    %28 = vector.shape_cast %27 : vector<1x128x128xf32> to vector<128x128xf32>
    %cst_24 = arith.constant dense<0.000000e+00> : vector<8x128xf32>
    %29 = tpu.matmul %26, %28, %cst_24 {dimension_numbers = #tpu.dot_dimension_numbers<[1], [0], [0], [1], [0, 0, 1, 1], [], []>} : vector<8x128xf32>, vector<128x128xf32>, vector<8x128xf32> -> vector<8x128xf32>
    %c1_25 = arith.constant 1 : index
    %c0_26 = arith.constant 0 : index
    %c0_27 = arith.constant 0 : index
    %30 = vector.load %arg5[%c1_25, %c0_26, %c0_27] : memref<2x1x128xf32, #tpu.memory_space<vmem>>, vector<1x1x128xf32>
    %31 = vector.shape_cast %30 : vector<1x1x128xf32> to vector<1x128xf32>
    %32 = vector.broadcast %31 : vector<1x128xf32> to vector<8x128xf32>
    %33 = arith.addf %29, %32 : vector<8x128xf32>
    %cst_28 = arith.constant 0.000000e+00 : f32
    %34 = vector.broadcast %cst_28 : f32 to vector<8x128xf32>
    %35 = arith.maximumf %33, %34 : vector<8x128xf32>
    %c1_29 = arith.constant 1 : index
    %c0_30 = arith.constant 0 : index
    %c0_31 = arith.constant 0 : index
    %36 = vector.load %arg6[%c1_29, %c0_30, %c0_31] : memref<2x128x128xf32, #tpu.memory_space<vmem>>, vector<1x128x128xf32>
    %37 = vector.shape_cast %36 : vector<1x128x128xf32> to vector<128x128xf32>
    %cst_32 = arith.constant dense<0.000000e+00> : vector<8x128xf32>
    %38 = tpu.matmul %35, %37, %cst_32 {dimension_numbers = #tpu.dot_dimension_numbers<[1], [0], [0], [1], [0, 0, 1, 1], [], []>} : vector<8x128xf32>, vector<128x128xf32>, vector<8x128xf32> -> vector<8x128xf32>
    %c1_33 = arith.constant 1 : index
    %c0_34 = arith.constant 0 : index
    %c0_35 = arith.constant 0 : index
    %39 = vector.load %arg7[%c1_33, %c0_34, %c0_35] : memref<2x1x128xf32, #tpu.memory_space<vmem>>, vector<1x1x128xf32>
    %40 = vector.shape_cast %39 : vector<1x1x128xf32> to vector<1x128xf32>
    %41 = vector.broadcast %40 : vector<1x128xf32> to vector<8x128xf32>
    %42 = arith.addf %38, %41 : vector<8x128xf32>
    %43 = arith.addf %42, %26 : vector<8x128xf32>
    %cst_36 = arith.constant 0.000000e+00 : f32
    %44 = vector.broadcast %cst_36 : f32 to vector<8x128xf32>
    %45 = arith.maximumf %43, %44 : vector<8x128xf32>
    %c0_37 = arith.constant 0 : index
    %c0_38 = arith.constant 0 : index
    %46 = vector.load %arg8[%c0_37, %c0_38] : memref<8x128xf32, #tpu.memory_space<vmem>>, vector<8x128xf32>
    tpu.vector_store %arg8[%c0_37, %c0_38], %45 {strides = array<i32>} : memref<8x128xf32, #tpu.memory_space<vmem>>, vector<8x128xf32>,
    return
  }
  func.func @transform_0(%arg0: i32) -> (i32, i32) {
    %c0_i32 = arith.constant 0 : i32
    %c0_i32_0 = arith.constant 0 : i32
    return %arg0, %c0_i32 : i32, i32
  }
  func.func @transform_1(%arg0: i32) -> (i32, i32) {
    %c0_i32 = arith.constant 0 : i32
    %c0_i32_0 = arith.constant 0 : i32
    %c0_i32_1 = arith.constant 0 : i32
    return %c0_i32, %c0_i32_0 : i32, i32
  }
  func.func @transform_2(%arg0: i32) -> (i32, i32) {
    %c0_i32 = arith.constant 0 : i32
    %c0_i32_0 = arith.constant 0 : i32
    %c0_i32_1 = arith.constant 0 : i32
    return %c0_i32, %c0_i32_0 : i32, i32
  }
  func.func @transform_3(%arg0: i32) -> (i32, i32, i32) {
    %c0_i32 = arith.constant 0 : i32
    %c0_i32_0 = arith.constant 0 : i32
    %c0_i32_1 = arith.constant 0 : i32
    %c0_i32_2 = arith.constant 0 : i32
    return %c0_i32, %c0_i32_0, %c0_i32_1 : i32, i32, i32
  }
  func.func @transform_4(%arg0: i32) -> (i32, i32, i32) {
    %c0_i32 = arith.constant 0 : i32
    %c0_i32_0 = arith.constant 0 : i32
    %c0_i32_1 = arith.constant 0 : i32
    %c0_i32_2 = arith.constant 0 : i32
    return %c0_i32, %c0_i32_0, %c0_i32_1 : i32, i32, i32
  }
  func.func @transform_5(%arg0: i32) -> (i32, i32, i32) {
    %c0_i32 = arith.constant 0 : i32
    %c0_i32_0 = arith.constant 0 : i32
    %c0_i32_1 = arith.constant 0 : i32
    %c0_i32_2 = arith.constant 0 : i32
    return %c0_i32, %c0_i32_0, %c0_i32_1 : i32, i32, i32
  }
  func.func @transform_6(%arg0: i32) -> (i32, i32, i32) {
    %c0_i32 = arith.constant 0 : i32
    %c0_i32_0 = arith.constant 0 : i32
    %c0_i32_1 = arith.constant 0 : i32
    %c0_i32_2 = arith.constant 0 : i32
    return %c0_i32, %c0_i32_0, %c0_i32_1 : i32, i32, i32
  }
  func.func @transform_7(%arg0: i32) -> (i32, i32) {
    %c0_i32 = arith.constant 0 : i32
    %c0_i32_0 = arith.constant 0 : i32
    return %arg0, %c0_i32 : i32, i32
  }
}

</mosaic_0001>

<bundles_post_ra>
// kernel: tpu_custom_call.1
= control target key start
LH: loop header
LB: loop body
LE: loop exit
PB: predicated region body
PF: predicated region fallthrough
CT: control target
= control target key end

     0   :  { %12 = vsyncpa [#allocation3], 0  ;;  %s1281_s0 = inlined_call_operand.hbm [shape: f32[8,128], index: 0, kind: input, shape index: {}]   ;;  %s1282_s1 = inlined_call_operand.hbm [shape: f32[128,128], index: 1, kind: input, shape index: {}]   ;;  %s1283_s2 = inlined_call_operand.vmem [shape: f32[1,128], index: 2, kind: input, shape index: {}]   ;;  %s1284_s3 = inlined_call_operand.hbm [shape: f32[2,128,128], index: 3, kind: input, shape index: {}]   ;;  %s1285_s4 = inlined_call_operand.vmem [shape: f32[2,1,128], index: 4, kind: input, shape index: {}]   ;;  %s1286_s5 = inlined_call_operand.hbm [shape: f32[2,128,128], index: 5, kind: input, shape index: {}]   ;;  %s1287_s6 = inlined_call_operand.vmem [shape: f32[2,1,128], index: 6, kind: input, shape index: {}]   ;;  %s1288_s7 = inlined_call_operand.hbm [shape: f32[8,128], index: 7, kind: output, shape index: {}]  }
   0x1   :  { %13 = vsyncpa [#allocation6], 0 }
   0x2   :  { %14 = vsyncpa [#allocation9], 0 }
   0x3   :  { %15 = vsyncpa [#allocation4], 0  ;;  %s1090_s24 = smov [#allocation5]   ;;  %s972_s28 = scalar_lea.hbm %s1282_s1, 2048 }
   0x4   :  { %s31_s25 = sshll.u32 %s1090_s24, 4  ;;  %p973_p0 = scmp.ne.s32.totalorder %s1282_s1, %s972_s28  ;;  %s32_s25 = int_to_ptr.vmem [resolvable:$true] %s31_s25 }
   0x5   :  { %p976_p1 = scmp.lt.u32.totalorder %s972_s28, %s1282_s1 }
   0x7   :  { %p978_p2 = pnand %p976_p1, %p973_p0 }
   0x9   :  { %981 = shalt.err (!%p978_p2)
}
   0xa   :  { %s982_s10 = scalar_lea.vmem %s32_s25, 2048  ;;  %p987_p4 = scmp.lt.s32.totalorder %s32_s25, %s32_s25 }
   0xb   :  { %p983_p3 = scmp.ne.s32.totalorder %s32_s25, %s982_s10  ;;  %p988_p5 = scmp.lt.s32.totalorder %s982_s10, %s982_s10 }
   0xd   :  { %p989_p6 = por %p988_p5, %p987_p4 }
   0xf   :  { %p990_p7 = pnand %p989_p6, %p983_p3 }
  0x11   :  { %993 = shalt.err (!%p990_p7)
}
  0x12   :  { %s1091_s11 = smov 128   ;;  %s1092_s12 = smov 8  }
  0x13   :  { %37 = dma.hbm_to_vmem [thread:$0]  %s1282_s1, 2048, %s32_s25, [#allocation6], %s1091_s11, %s1091_s11, %s1092_s12  }
  0x14   :  { %s1093_s15 = smov [#allocation2]   ;;  %s1094_s17 = smov [#allocation7]  }
  0x15   :  { %s22_s16 = sshll.u32 %s1093_s15, 4  ;;  %s45_s18 = sshll.u32 %s1094_s17, 4  ;;  %s23_s16 = int_to_ptr.vmem [resolvable:$true] %s22_s16  ;;  %s46_s18 = int_to_ptr.vmem [resolvable:$true] %s45_s18 }
  0x16   :  { %s994_s21 = scalar_lea.hbm %s1281_s0, 128 }
  0x17   :  { %p995_p8 = scmp.ne.s32.totalorder %s1281_s0, %s994_s21  ;;  %p998_p9 = scmp.lt.u32.totalorder %s994_s21, %s1281_s0 }
  0x19   :  { %p1000_p10 = pnand %p998_p9, %p995_p8 }
  0x1b   :  { %1003 = shalt.err (!%p1000_p10)
}
  0x1c   :  { %s1004_s1 = scalar_lea.vmem %s23_s16, 128  ;;  %p1009_p12 = scmp.lt.s32.totalorder %s23_s16, %s23_s16 }
  0x1d   :  { %p1005_p11 = scmp.ne.s32.totalorder %s23_s16, %s1004_s1  ;;  %p1010_p13 = scmp.lt.s32.totalorder %s1004_s1, %s1004_s1 }
  0x1f   :  { %p1011_p0 = por %p1010_p13, %p1009_p12 }
  0x21   :  { %p1012_p1 = pnand %p1011_p0, %p1005_p11 }
  0x23   :  { %1015 = shalt.err (!%p1012_p1)
}
  0x24   :  { %25 = dma.hbm_to_vmem [thread:$0]  %s1281_s0, 128, %s23_s16, [#allocation3]  }
  0x25   :  { %s1016_s30 = scalar_lea.hbm %s1284_s3, 4096 }
  0x26   :  { %p1017_p2 = scmp.ne.s32.totalorder %s1284_s3, %s1016_s30  ;;  %p1020_p3 = scmp.lt.u32.totalorder %s1016_s30, %s1284_s3 }
  0x28   :  { %p1022_p4 = pnand %p1020_p3, %p1017_p2 }
  0x2a   :  { %1025 = shalt.err (!%p1022_p4)
}
  0x2b   :  { %s1026_s14 = scalar_lea.vmem %s46_s18, 4096  ;;  %p1031_p6 = scmp.lt.s32.totalorder %s46_s18, %s46_s18 }
  0x2c   :  { %p1027_p5 = scmp.ne.s32.totalorder %s46_s18, %s1026_s14  ;;  %p1032_p7 = scmp.lt.s32.totalorder %s1026_s14, %s1026_s14 }
  0x2e   :  { %p1033_p8 = por %p1032_p7, %p1031_p6 }
  0x30   :  { %p1034_p9 = pnand %p1033_p8, %p1027_p5 }
  0x32   :  { %1037 = shalt.err (!%p1034_p9)
}
  0x33   :  { %51 = dma.hbm_to_vmem [thread:$0]  %s1284_s3, 4096, %s46_s18, [#allocation6], %s1091_s11, %s1091_s11, %s1092_s12  }
  0x34   :  { %s1095_s16 = smov [#allocation8]   ;;  %s1038_s21 = scalar_lea.hbm %s1286_s5, 4096 }
  0x35   :  { %s59_s17 = sshll.u32 %s1095_s16, 4  ;;  %p1039_p10 = scmp.ne.s32.totalorder %s1286_s5, %s1038_s21  ;;  %s60_s17 = int_to_ptr.vmem [resolvable:$true] %s59_s17 }
  0x36   :  { %p1042_p11 = scmp.lt.u32.totalorder %s1038_s21, %s1286_s5 }
  0x38   :  { %p1044_p12 = pnand %p1042_p11, %p1039_p10 }
  0x3a   :  { %1047 = shalt.err (!%p1044_p12)
}
  0x3b   :  { %s1048_s1 = scalar_lea.vmem %s60_s17, 4096  ;;  %p1053_p0 = scmp.lt.s32.totalorder %s60_s17, %s60_s17 }
  0x3c   :  { %p1049_p13 = scmp.ne.s32.totalorder %s60_s17, %s1048_s1  ;;  %p1054_p1 = scmp.lt.s32.totalorder %s1048_s1, %s1048_s1 }
  0x3e   :  { %p1055_p2 = por %p1054_p1, %p1053_p0 }
  0x40   :  { %p1056_p3 = pnand %p1055_p2, %p1049_p13 }
  0x42   :  { %1059 = shalt.err (!%p1056_p3)
}
  0x43   :  { %65 = dma.hbm_to_vmem [thread:$0]  %s1286_s5, 4096, %s60_s17, [#allocation9], %s1091_s11, %s1091_s11, %s1092_s12  }
  0x44   :  { %1082 = dma.done.wait [#allocation3], 128  }
  0x45   :  { %1083 = vsyncadd [#allocation3], 4294967168 }
  0x46   :  { %1084 = dma.done.wait [#allocation6], 6144  }
  0x47   :  { %1085 = vsyncadd [#allocation6], 4294961152 }
  0x48   :  { %1086 = dma.done.wait [#allocation9], 4096  }
  0x49   :  { %1087 = vsyncadd [#allocation9], 4294963200  ;;  %v1096_v0 = vmov 0.0|0.0   ;;  %vm1097_vm0 = vmmov 0   ;;  %v1098_v1 = vmov 0.0   ;;  %v81_v2 = vld [vmem:[#allocation5] sm:$0xff] }
  0x4a   :  { %842 = vmatprep.subr.bf16.mxu0 %v1096_v0  ;;  %699 = vmatprep.mubr.msk.f32.mxu0 %vm1097_vm0, %v1098_v1  ;;  %v82_v3 = vld [vmem:[#allocation5 + $0x8] sm:$0xff]  ;;  %v83_v4 = vld [vmem:[#allocation5 + $0x10] sm:$0xff]  ;;  %v84_v6 = vld [vmem:[#allocation5 + $0x18] sm:$0xff]  ;;  %s1099_s9 = smov [#allocation10]  }
  0x4b   :  { %866 = vmatprep.subr.bf16.mxu1 %v1096_v0  ;;  %734 = vmatprep.mubr.msk.f32.mxu1 %vm1097_vm0, %v1098_v1  ;;  %v843_v5 = vpack.c.bf16 %v82_v3, %v81_v2  ;;  %v846_v7 = vpack.c.bf16 %v84_v6, %v83_v4  ;;  %v85_v8 = vld [vmem:[#allocation5 + $0x20] sm:$0xff]  ;;  %v86_v9 = vld [vmem:[#allocation5 + $0x28] sm:$0xff]  ;;  %v177_v12 = vld [vmem:[#allocation7 + $0x10] sm:$0xff]  ;;  %s564_s10 = sshll.u32 %s1099_s9, 4  ;;  %s565_s10 = int_to_ptr.vmem [resolvable:$true] %s564_s10 }
  0x4c   :  { %v175_v10 = vld [vmem:[#allocation7] sm:$0xff]  ;;  %v176_v11 = vld [vmem:[#allocation7 + $0x8] sm:$0xff]  ;;  %v178_v13 = vld [vmem:[#allocation7 + $0x18] sm:$0xff]  ;;  %v849_v14 = vpack.c.bf16 %v86_v9, %v85_v8  ;;  %s1060_s13 = scalar_lea.vmem %s565_s10, 128  ;;  %p1065_p5 = scmp.lt.s32.totalorder %s565_s10, %s565_s10 }
  0x4d   :  { %844 = vmatpush3.bf16.msra.mxu0 %v843_v5  ;;  %v867_v15 = vpack.c.bf16 %v176_v11, %v175_v10  ;;  %v87_v16 = vld [vmem:[#allocation5 + $0x30] sm:$0xff]  ;;  %v88_v17 = vld [vmem:[#allocation5 + $0x38] sm:$0xff]  ;;  %v870_v18 = vpack.c.bf16 %v178_v13, %v177_v12  ;;  %v179_v19 = vld [vmem:[#allocation7 + $0x20] sm:$0xff]  ;;  %p1061_p4 = scmp.ne.s32.totalorder %s565_s10, %s1060_s13  ;;  %p1066_p6 = scmp.lt.s32.totalorder %s1060_s13, %s1060_s13 }
  0x4e   :  { %845 = vmatprep.subr.bf16.mxu0 %v1096_v0  ;;  %v180_v20 = vld [vmem:[#allocation7 + $0x28] sm:$0xff]  ;;  %v852_v21 = vpack.c.bf16 %v88_v17, %v87_v16  ;;  %v89_v22 = vld [vmem:[#allocation5 + $0x40] sm:$0xff]  ;;  %v181_v25 = vld [vmem:[#allocation7 + $0x30] sm:$0xff] }
  0x4f   :  { %868 = vmatpush3.bf16.msra.mxu1 %v867_v15  ;;  %v90_v23 = vld [vmem:[#allocation5 + $0x48] sm:$0xff]  ;;  %v873_v24 = vpack.c.bf16 %v180_v20, %v179_v19  ;;  %v182_v26 = vld [vmem:[#allocation7 + $0x38] sm:$0xff]  ;;  %v91_v28 = vld [vmem:[#allocation5 + $0x50] sm:$0xff]  ;;  %p1067_p7 = por %p1066_p6, %p1065_p5 }
  0x50   :  { %869 = vmatprep.subr.bf16.mxu1 %v1096_v0  ;;  %v855_v27 = vpack.c.bf16 %v90_v23, %v89_v22  ;;  %v92_v29 = vld [vmem:[#allocation5 + $0x58] sm:$0xff]  ;;  %v876_v30 = vpack.c.bf16 %v182_v26, %v181_v25  ;;  %v183_v31 = vld [vmem:[#allocation7 + $0x40] sm:$0xff]  ;;  %v184_v32 = vld [vmem:[#allocation7 + $0x48] sm:$0xff] }
  0x51   :  { %847 = vmatpush3.bf16.msra.mxu0 %v846_v7  ;;  %v858_v33 = vpack.c.bf16 %v92_v29, %v91_v28  ;;  %v93_v34 = vld [vmem:[#allocation5 + $0x60] sm:$0xff]  ;;  %v94_v35 = vld [vmem:[#allocation5 + $0x68] sm:$0xff]  ;;  %v879_v36 = vpack.c.bf16 %v184_v32, %v183_v31  ;;  %v185_v37 = vld [vmem:[#allocation7 + $0x50] sm:$0xff]  ;;  %p1068_p8 = pnand %p1067_p7, %p1061_p4 }
  0x52   :  { %848 = vmatprep.subr.bf16.mxu0 %v1096_v0  ;;  %v186_v38 = vld [vmem:[#allocation7 + $0x58] sm:$0xff]  ;;  %v861_v39 = vpack.c.bf16 %v94_v35, %v93_v34  ;;  %v95_v40 = vld [vmem:[#allocation5 + $0x70] sm:$0xff]  ;;  %v187_v43 = vld [vmem:[#allocation7 + $0x60] sm:$0xff] }
  0x53   :  { %871 = vmatpush3.bf16.msra.mxu1 %v870_v18  ;;  %v96_v41 = vld [vmem:[#allocation5 + $0x78] sm:$0xff]  ;;  %v882_v42 = vpack.c.bf16 %v186_v38, %v185_v37  ;;  %v188_v44 = vld [vmem:[#allocation7 + $0x68] sm:$0xff]  ;;  %v189_v48 = vld [vmem:[#allocation7 + $0x70] sm:$0xff] }
  0x54   :  { %872 = vmatprep.subr.bf16.mxu1 %v1096_v0  ;;  %v864_v45 = vpack.c.bf16 %v96_v41, %v95_v40  ;;  %v885_v46 = vpack.c.bf16 %v188_v44, %v187_v43  ;;  %v80_v47 = vld [vmem:[#allocation2] sm:$0xff]  ;;  %v269_v51 = vld [vmem:[#allocation8] sm:$0xff]  ;;  %v270_v52 = vld [vmem:[#allocation8 + $0x8] sm:$0xff] }
  0x55   :  { %850 = vmatpush3.bf16.msra.mxu0 %v849_v14  ;;  %v190_v49 = vld [vmem:[#allocation7 + $0x78] sm:$0xff]  ;;  %v271_v53 = vld [vmem:[#allocation8 + $0x10] sm:$0xff]  ;;  %v891_v54 = vpack.c.bf16 %v270_v52, %v269_v51  ;;  %v273_v57 = vld [vmem:[#allocation8 + $0x20] sm:$0xff] }
  0x56   :  { %851 = vmatprep.subr.bf16.mxu0 %v1096_v0  ;;  %v888_v50 = vpack.c.bf16 %v190_v49, %v189_v48  ;;  %v272_v55 = vld [vmem:[#allocation8 + $0x18] sm:$0xff]  ;;  %v274_v58 = vld [vmem:[#allocation8 + $0x28] sm:$0xff]  ;;  %v275_v60 = vld [vmem:[#allocation8 + $0x30] sm:$0xff] }
  0x57   :  { %874 = vmatpush3.bf16.msra.mxu1 %v873_v24  ;;  %v894_v56 = vpack.c.bf16 %v272_v55, %v271_v53  ;;  %v897_v59 = vpack.c.bf16 %v274_v58, %v273_v57  ;;  %v276_v61 = vld [vmem:[#allocation8 + $0x38] sm:$0xff]  ;;  %v277_v63 = vld [vmem:[#allocation8 + $0x40] sm:$0xff]  ;;  %v278_v2 = vld [vmem:[#allocation8 + $0x48] sm:$0xff] }
  0x58   :  { %875 = vmatprep.subr.bf16.mxu1 %v1096_v0  ;;  %v900_v62 = vpack.c.bf16 %v276_v61, %v275_v60  ;;  %v903_v3 = vpack.c.bf16 %v278_v2, %v277_v63  ;;  %v279_v4 = vld [vmem:[#allocation8 + $0x50] sm:$0xff]  ;;  %v280_v5 = vld [vmem:[#allocation8 + $0x58] sm:$0xff]  ;;  %v281_v7 = vld [vmem:[#allocation8 + $0x60] sm:$0xff] }
  0x59   :  { %853 = vmatpush3.bf16.msra.mxu0 %v852_v21  ;;  %v906_v6 = vpack.c.bf16 %v280_v5, %v279_v4  ;;  %v282_v8 = vld [vmem:[#allocation8 + $0x68] sm:$0xff]  ;;  %v575_v10 = vld [vmem:[%s1283_s2] ss:$0 sm:$0xff]  ;;  %v283_v15 = vld [vmem:[#allocation8 + $0x70] sm:$0xff] }
  0x5a   :  { %854 = vmatprep.subr.bf16.mxu0 %v1096_v0  ;;  %v909_v9 = vpack.c.bf16 %v282_v8, %v281_v7  ;;  %v284_v16 = vld [vmem:[#allocation8 + $0x78] sm:$0xff]  ;;  %v365_v18 = vld [vmem:[#allocation7 + $0x80] sm:$0xff]  ;;  %v366_v19 = vld [vmem:[#allocation7 + $0x88] sm:$0xff] }
  0x5b   :  { %877 = vmatpush3.bf16.msra.mxu1 %v876_v30  ;;  %v912_v17 = vpack.c.bf16 %v284_v16, %v283_v15  ;;  %v367_v20 = vld [vmem:[#allocation7 + $0x90] sm:$0xff]  ;;  %v915_v21 = vpack.c.bf16 %v366_v19, %v365_v18  ;;  %v368_v22 = vld [vmem:[#allocation7 + $0x98] sm:$0xff]  ;;  %v369_v24 = vld [vmem:[#allocation7 + $0xa0] sm:$0xff] }
  0x5c   :  { %878 = vmatprep.subr.bf16.mxu1 %v1096_v0  ;;  %v918_v23 = vpack.c.bf16 %v368_v22, %v367_v20  ;;  %v370_v25 = vld [vmem:[#allocation7 + $0xa8] sm:$0xff]  ;;  %v372_v28 = vld [vmem:[#allocation7 + $0xb8] sm:$0xff]  ;;  %v373_v30 = vld [vmem:[#allocation7 + $0xc0] sm:$0xff] }
  0x5d   :  { %856 = vmatpush3.bf16.msra.mxu0 %v855_v27  ;;  %v921_v26 = vpack.c.bf16 %v370_v25, %v369_v24  ;;  %v371_v27 = vld [vmem:[#allocation7 + $0xb0] sm:$0xff]  ;;  %v374_v31 = vld [vmem:[#allocation7 + $0xc8] sm:$0xff]  ;;  %v376_v34 = vld [vmem:[#allocation7 + $0xd8] sm:$0xff] }
  0x5e   :  { %857 = vmatprep.subr.bf16.mxu0 %v1096_v0  ;;  %v924_v29 = vpack.c.bf16 %v372_v28, %v371_v27  ;;  %v927_v32 = vpack.c.bf16 %v374_v31, %v373_v30  ;;  %v377_v41 = vld [vmem:[#allocation7 + $0xe0] sm:$0xff]  ;;  %v379_v44 = vld [vmem:[#allocation7 + $0xf0] sm:$0xff]  ;;  %v462_v48 = vld [vmem:[#allocation8 + $0x88] sm:$0xff] }
  0x5f   :  { %880 = vmatpush3.bf16.msra.mxu1 %v879_v36  ;;  %v576_v36 = vld [vmem:[%s1285_s4] ss:$0 sm:$0xff]  ;;  %v463_v49 = vld [vmem:[#allocation8 + $0x90] sm:$0xff]  ;;  %v466_v53 = vld [vmem:[#allocation8 + $0xa8] sm:$0xff] }
  0x60   :  { %881 = vmatprep.subr.bf16.mxu1 %v1096_v0  ;;  %v464_v51 = vld [vmem:[#allocation8 + $0x98] sm:$0xff]  ;;  %v467_v55 = vld [vmem:[#allocation8 + $0xb0] sm:$0xff]  ;;  %v469_v58 = vld [vmem:[#allocation8 + $0xc0] sm:$0xff] }
  0x61   :  { %859 = vmatpush3.bf16.msra.mxu0 %v858_v33  ;;  %v375_v33 = vld [vmem:[#allocation7 + $0xd0] sm:$0xff]  ;;  %v942_v52 = vpack.c.bf16 %v464_v51, %v463_v49  ;;  %v473_v2 = vld [vmem:[#allocation8 + $0xe0] sm:$0xff]  ;;  %v577_v5 = vld [vmem:[%s1287_s6] ss:$0 sm:$0xff] }
  0x62   :  { %860 = vmatprep.subr.bf16.mxu0 %v1096_v0  ;;  %v930_v35 = vpack.c.bf16 %v376_v34, %v375_v33  ;;  %v471_v61 = vld [vmem:[#allocation8 + $0xd0] sm:$0xff] }
  0x63   :  { %883 = vmatpush3.bf16.msra.mxu1 %v882_v42  ;;  %v378_v42 = vld [vmem:[#allocation7 + $0xe8] sm:$0xff] }
  0x64   :  { %884 = vmatprep.subr.bf16.mxu1 %v1096_v0  ;;  %v933_v43 = vpack.c.bf16 %v378_v42, %v377_v41 }
  0x65   :  { %862 = vmatpush3.bf16.msra.mxu0 %v861_v39 }
  0x66   :  { %863 = vmatprep.subr.bf16.mxu0 %v1096_v0 }
  0x67   :  { %886 = vmatpush3.bf16.msra.mxu1 %v885_v46 }
  0x68   :  { %887 = vmatprep.subr.bf16.mxu1 %v1096_v0 }
  0x69   :  { %865 = vmatpush3.bf16.msra.mxu0 %v864_v45  ;;  %v380_v45 = vld [vmem:[#allocation7 + $0xf8] sm:$0xff] }
  0x6a   :  { %890 = vmatprep.subr.bf16.mxu0 %v1096_v0  ;;  %v936_v46 = vpack.c.bf16 %v380_v45, %v379_v44 }
  0x6b   :  { %889 = vmatpush3.bf16.msra.mxu1 %v888_v50 }
  0x6c   :  { %700 = vmatmul.mubr.f32.vlgmr.msra.gmra.mrb[0].mxu0 %v80_v47  ;;  %914 = vmatprep.subr.bf16.mxu1 %v1096_v0  ;;  %v461_v47 = vld [vmem:[#allocation8 + $0x80] sm:$0xff] }
  0x6d   :  { %769 = vmatprep.mubr.msk.f32.mxu0 %vm1097_vm0, %v1098_v1  ;;  %892 = vmatpush3.bf16.msra.mxu0 %v891_v54  ;;  %v939_v50 = vpack.c.bf16 %v462_v48, %v461_v47 }
  0x6e   :  { %893 = vmatprep.subr.bf16.mxu0 %v1096_v0 }
  0x71   :  { %895 = vmatpush3.bf16.msra.mxu0 %v894_v56  ;;  %v468_v56 = vld [vmem:[#allocation8 + $0xb8] sm:$0xff] }
  0x72   :  { %896 = vmatprep.subr.bf16.mxu0 %v1096_v0  ;;  %v948_v57 = vpack.c.bf16 %v468_v56, %v467_v55 }
  0x75   :  { %898 = vmatpush3.bf16.msra.mxu0 %v897_v59  ;;  %v470_v59 = vld [vmem:[#allocation8 + $0xc8] sm:$0xff] }
  0x76   :  { %899 = vmatprep.subr.bf16.mxu0 %v1096_v0  ;;  %v951_v60 = vpack.c.bf16 %v470_v59, %v469_v58 }
  0x79   :  { %901 = vmatpush3.bf16.msra.mxu0 %v900_v62  ;;  %v472_v62 = vld [vmem:[#allocation8 + $0xd8] sm:$0xff] }
  0x7a   :  { %902 = vmatprep.subr.bf16.mxu0 %v1096_v0  ;;  %v954_v63 = vpack.c.bf16 %v472_v62, %v471_v61 }
  0x7d   :  { %904 = vmatpush3.bf16.msra.mxu0 %v903_v3  ;;  %v474_v3 = vld [vmem:[#allocation8 + $0xe8] sm:$0xff] }
  0x7e   :  { %905 = vmatprep.subr.bf16.mxu0 %v1096_v0  ;;  %v957_v4 = vpack.c.bf16 %v474_v3, %v473_v2 }
  0x81   :  { %907 = vmatpush3.bf16.msra.mxu0 %v906_v6 }
  0x82   :  { %908 = vmatprep.subr.bf16.mxu0 %v1096_v0 }
  0x85   :  { %910 = vmatpush3.bf16.msra.mxu0 %v909_v9 }
  0x86   :  { %911 = vmatprep.subr.bf16.mxu0 %v1096_v0 }
  0x89   :  { %913 = vmatpush3.bf16.msra.mxu0 %v912_v17 }
  0x8a   :  { %938 = vmatprep.subr.bf16.mxu0 %v1096_v0 }
 0x13f   :  { %v170_v11 = vpop.f32.mrb[0].mxu0 }
 0x140   :  { %v1231_v12 = vadd.f32 %v575_v10, %v170_v11  ;;  %v701_v13 = vpop.f32.mrb[1].mxu0  ;;  %v475_v11 = vld [vmem:[#allocation8 + $0xf0] sm:$0xff] }
 0x141   :  { %v476_v13 = vld [vmem:[#allocation8 + $0xf8] sm:$0xff] }
 0x142   :  { %v174_v14 = vmax.f32 %v1231_v12, 0.0  ;;  %v960_v15 = vpack.c.bf16 %v476_v13, %v475_v11  ;;  %v581_v12 = vld [vmem:[%s1287_s6 + $0x1] ss:$0 sm:$0xff] }
 0x144   :  { %735 = vmatmul.mubr.f32.vlgmr.msra.gmra.mrb[0].mxu1 %v174_v14 }
 0x145   :  { %804 = vmatprep.mubr.msk.f32.mxu1 %vm1097_vm0, %v1098_v1  ;;  %916 = vmatpush3.bf16.msra.mxu1 %v915_v21 }
 0x146   :  { %917 = vmatprep.subr.bf16.mxu1 %v1096_v0 }
 0x149   :  { %919 = vmatpush3.bf16.msra.mxu1 %v918_v23 }
 0x14a   :  { %920 = vmatprep.subr.bf16.mxu1 %v1096_v0 }
 0x14d   :  { %922 = vmatpush3.bf16.msra.mxu1 %v921_v26 }
 0x14e   :  { %923 = vmatprep.subr.bf16.mxu1 %v1096_v0 }
 0x151   :  { %925 = vmatpush3.bf16.msra.mxu1 %v924_v29 }
 0x152   :  { %926 = vmatprep.subr.bf16.mxu1 %v1096_v0 }
 0x155   :  { %928 = vmatpush3.bf16.msra.mxu1 %v927_v32 }
 0x156   :  { %929 = vmatprep.subr.bf16.mxu1 %v1096_v0 }
 0x159   :  { %931 = vmatpush3.bf16.msra.mxu1 %v930_v35 }
 0x15a   :  { %932 = vmatprep.subr.bf16.mxu1 %v1096_v0 }
 0x15d   :  { %934 = vmatpush3.bf16.msra.mxu1 %v933_v43 }
 0x15e   :  { %935 = vmatprep.subr.bf16.mxu1 %v1096_v0 }
 0x161   :  { %937 = vmatpush3.bf16.msra.mxu1 %v936_v46 }
 0x217   :  { %v264_v37 = vpop.f32.mrb[0].mxu1 }
 0x218   :  { %v265_v38 = vadd.f32 %v576_v36, %v264_v37  ;;  %v736_v39 = vpop.f32.mrb[1].mxu1 }
 0x21a   :  { %v268_v40 = vmax.f32 %v265_v38, 0.0 }
 0x21c   :  { %770 = vmatmul.mubr.f32.vlgmr.msra.gmra.mrb[2].mxu0 %v268_v40 }
 0x21d   :  { %839 = vmatprep.mubr.msk.f32.mxu0 %vm1097_vm0, %v1098_v1  ;;  %940 = vmatpush3.bf16.msra.mxu0 %v939_v50  ;;  %v465_v1 = vld [vmem:[#allocation8 + $0xa0] sm:$0xff] }
 0x21e   :  { %941 = vmatprep.subr.bf16.mxu0 %v1096_v0  ;;  %v945_v54 = vpack.c.bf16 %v466_v53, %v465_v1 }
 0x221   :  { %943 = vmatpush3.bf16.msra.mxu0 %v942_v52 }
 0x222   :  { %944 = vmatprep.subr.bf16.mxu0 %v1096_v0 }
 0x225   :  { %946 = vmatpush3.bf16.msra.mxu0 %v945_v54 }
 0x226   :  { %947 = vmatprep.subr.bf16.mxu0 %v1096_v0 }
 0x229   :  { %949 = vmatpush3.bf16.msra.mxu0 %v948_v57 }
 0x22a   :  { %950 = vmatprep.subr.bf16.mxu0 %v1096_v0 }
 0x22d   :  { %952 = vmatpush3.bf16.msra.mxu0 %v951_v60 }
 0x22e   :  { %953 = vmatprep.subr.bf16.mxu0 %v1096_v0 }
 0x231   :  { %955 = vmatpush3.bf16.msra.mxu0 %v954_v63 }
 0x232   :  { %956 = vmatprep.subr.bf16.mxu0 %v1096_v0 }
 0x235   :  { %958 = vmatpush3.bf16.msra.mxu0 %v957_v4 }
 0x236   :  { %959 = vmatprep.subr.bf16.mxu0 %v1096_v0  ;;  %v579_v0 = vld [vmem:[%s1285_s4 + $0x1] ss:$0 sm:$0xff] }
 0x239   :  { %961 = vmatpush3.bf16.msra.mxu0 %v960_v15 }
 0x2ef   :  { %v358_v6 = vpop.f32.mrb[2].mxu0 }
 0x2f0   :  { %v359_v7 = vadd.f32 %v577_v5, %v358_v6  ;;  %v771_v8 = vpop.f32.mrb[3].mxu0 }
 0x2f2   :  { %v362_v9 = vadd.f32 %v359_v7, %v174_v14 }
 0x2f4   :  { %v363_v10 = vmax.f32 %v362_v9, 0.0 }
 0x2f6   :  { %805 = vmatmul.mubr.f32.vlgmr.msra.gmra.mrb[2].mxu1 %v363_v10 }
 0x3c9   :  { %v455_v16 = vpop.f32.mrb[2].mxu1 }
 0x3ca   :  { %v456_v17 = vadd.f32 %v579_v0, %v455_v16  ;;  %v806_v18 = vpop.f32.mrb[3].mxu1 }
 0x3cc   :  { %v459_v19 = vmax.f32 %v456_v17, 0.0 }
 0x3ce   :  { %840 = vmatmul.mubr.f32.vlgmr.msra.gmra.mrb[4].mxu0 %v459_v19 }
 0x4a1   :  { %v551_v14 = vpop.f32.mrb[4].mxu0 }
 0x4a2   :  { %v552_v20 = vadd.f32 %v581_v12, %v551_v14  ;;  %v841_v21 = vpop.f32.mrb[5].mxu0 }
 0x4a4   :  { %v555_v22 = vadd.f32 %v552_v20, %v363_v10 }
 0x4a6   :  { %v556_v23 = vmax.f32 %v555_v22, 0.0 }
 0x4a8   :  { %557 = vst [vmem:[#allocation10] sm:$0xff] %v556_v23 }
 0x4a9   :  { %1071 = shalt.err (!%p1068_p8)
}
 0x4aa   :  { %s1072_s6 = scalar_lea.hbm %s1288_s7, 128 }
 0x4ab   :  { %p1073_p9 = scmp.ne.s32.totalorder %s1288_s7, %s1072_s6  ;;  %p1076_p10 = scmp.lt.u32.totalorder %s1072_s6, %s1288_s7 }
 0x4ad   :  { %p1078_p11 = pnand %p1076_p10, %p1073_p9 }
 0x4af   :  { %1081 = shalt.err (!%p1078_p11)
}
 0x4b0   :  { %567 = dma.vmem_to_hbm [thread:$0]  %s565_s10, 128, %s1288_s7, [#allocation4]  }
 0x4b1   :  { %1088 = dma.done.wait [#allocation4], 128  }
 0x4b2   :  { %1089 = vsyncadd [#allocation4], 4294967168 }
 0x4b3   :  { %571 = vsyncpa [#allocation3], 1 }
 0x4b4   :  { %572 = vsyncpa [#allocation6], 1 }
 0x4b5   :  { %573 = vsyncpa [#allocation9], 1 }
 0x4b6   :  { %574 = vsyncpa [#allocation4], 1 }

</bundles_post_ra>
